<compile_context>
chip_gen: v7x
topology: tpu7x:2x2x1
jax: 0.10.0
libtpu: 0.0.40
codegen_flags: <defaults>
</compile_context>

<pallas_src>
import jax
import jax.numpy as jnp
import numpy as np
from jax import lax
from jax.experimental import pallas as pl
from jax.experimental.pallas import tpu as pltpu

_LANES = 128
_TM_CAP = 2048            # 2048 x 128 x 4B = 1 MiB per stream per step (f32)


def _cdiv(a, b):
    return (a + b - 1) // b


def _round_up(x, m):
    return ((x + m - 1) // m) * m


def _sublane_multiple(dtype):
    # f32 -> 8, bf16 -> 16, int8/fp8 -> 32
    return max(8, 32 // jnp.dtype(dtype).itemsize)


def _tensorcores_per_device():
    """TensorCores a single pallas_call can shard a 'parallel' axis across."""
    try:
        kind = jax.devices()[0].device_kind.lower()
    except Exception:
        return 1
    # v4 / v5p megacore and v7x expose two TensorCores per Pallas device.
    if any(tag in kind for tag in ("v4", "v5p", "7x", "v7")):
        return 2
    return 1


def _choose_tm(n_rows, row_bytes_native, mult, tm_request):
    """Row-tile size and grid length for a (rows, cols) streaming kernel."""
    cap = max(mult, _round_up(min(tm_request, _TM_CAP), mult))
    # Keep the (2 in + 2 out) double-buffered working set bounded even when a
    # row is very wide (large-C fallback path).
    io_budget = 16 << 20
    cap_mem = max(mult, (io_budget // max(8 * row_bytes_native, 1)) // mult * mult)
    tm = min(cap, cap_mem)
    cores = _tensorcores_per_device()
    if cores > 1:
        # >= 2 grid steps per TensorCore so dimension_semantics=("parallel",)
        # actually has work to shard across the chip's cores (v7x / megacore).
        tm = min(tm, max(mult, _round_up(_cdiv(n_rows, 2 * cores), mult)))
    if tm >= n_rows:
        return n_rows, 1          # one block == full array (no edge masking)
    return tm, _cdiv(n_rows, tm)  # ragged last block handled by the pipeline


def _vmem_limit_bytes(tm, row_bytes_native, row_bytes_f32):
    io = 8 * tm * row_bytes_native       # (2 in + 2 out) x double buffer
    tmp = 10 * tm * row_bytes_f32        # generous bound on f32 temporaries
    # >= 32 MiB raises v5e's 16 MiB scoped default; <= 56 MiB stays inside
    # v7x's 64 MiB physical VMEM.
    return int(min(max(32 << 20, io + tmp + (2 << 20)), 56 << 20))


# ---------------------------------------------------------------------------
# Lane-dense kernel: G = 128 // Cp positions packed along the lane axis.
# ---------------------------------------------------------------------------
def _bigate_packed_kernel(f1_ref, f2_ref, wred_ref, bias_ref, bcat_ref,
                          o1_ref, o2_ref):
    f1 = f1_ref[...]                                    # (TM, 128) native dtype
    f2 = f2_ref[...]
    # f32 fused sum only for the gate logits (1x1 conv + sigmoid accuracy);
    # the gating multiply/add below stays in the native dtype.
    fuse = f1.astype(jnp.float32) + f2.astype(jnp.float32)

    # Both 1x1 convs at once: segmented channel reduction as one block-diagonal
    # MXU matmul (TM,128)@(128,2G) -> per-position logits for both gates.
    logits = jnp.dot(fuse, wred_ref[...],
                     preferred_element_type=jnp.float32) + bias_ref[...]
    sig = jax.nn.sigmoid(logits)                        # (TM, 2G), f32 on EUP

    # Single fused broadcast-back matmul (TM,2G)@(2G,256); the two 128-lane
    # aligned halves are s1 / s2 broadcast over each position's channel lanes.
    s = jnp.dot(sig, bcat_ref[...], preferred_element_type=jnp.float32)
    s1 = s[:, :_LANES].astype(f1.dtype)
    s2 = s[:, _LANES:].astype(f1.dtype)

    o1_ref[...] = (f1 + f2 * s1).astype(o1_ref.dtype)
    o2_ref[...] = (f2 + f1 * s2).astype(o2_ref.dtype)


# ---------------------------------------------------------------------------
# Wide-channel fallback (C > 128): rows are already lane-dense.
# ---------------------------------------------------------------------------
def _bigate_rowwise_kernel(f1_ref, f2_ref, w_ref, b_ref, o1_ref, o2_ref):
    f1 = f1_ref[...]                                    # (TM, C)
    f2 = f2_ref[...]
    fuse = f1.astype(jnp.float32) + f2.astype(jnp.float32)
    # Both gate logits with one MXU matmul (keeps XLU cross-lane reduces out).
    logits = jnp.dot(fuse, w_ref[...],
                     preferred_element_type=jnp.float32) + b_ref[...]  # (TM, 2)
    sig = jax.nn.sigmoid(logits)
    s1 = sig[:, 0:1].astype(f1.dtype)
    s2 = sig[:, 1:2].astype(f1.dtype)
    o1_ref[...] = (f1 + f2 * s1).astype(o1_ref.dtype)
    o2_ref[...] = (f2 + f1 * s2).astype(o2_ref.dtype)


def bigate_sum1d_2(feat1, feat2, wb, bb, wa, ba, *, tm=_TM_CAP):
    """feat1, feat2: (B, L, C). wb/wa: (C,) 1x1-conv weights, bb/ba: scalar biases."""
    assert feat1.shape == feat2.shape
    B, L, C = feat1.shape
    N = B * L
    dtype = feat1.dtype
    itemsize = jnp.dtype(dtype).itemsize
    mult = _sublane_multiple(dtype)

    wb = jnp.asarray(wb, jnp.float32).reshape(C)
    wa = jnp.asarray(wa, jnp.float32).reshape(C)
    bb = jnp.asarray(bb, jnp.float32).reshape(())
    ba = jnp.asarray(ba, jnp.float32).reshape(())

    # Pure HBM streaming (~0.02 flop/byte) -- tell XLA's scheduler.
    cost = pl.CostEstimate(flops=6 * N * C, transcendentals=2 * N,
                           bytes_accessed=4 * N * C * itemsize)

    f1 = feat1.reshape(N, C)
    f2 = feat2.reshape(N, C)

    if C <= _LANES:
        # ----- lane-dense path: fold G positions into the 128-lane axis. -----
        Cp = pl.next_power_of_2(C)       # smallest divisor of 128 that is >= C
        G = _LANES // Cp
        Npad = _round_up(N, G)           # pad rows only to a multiple of G
        NP = Npad // G
        if Npad != N or Cp != C:
            # Wrapper copy only when an in-place repack is impossible
            # (N % G != 0 or C not a divisor of 128).
            f1 = jnp.pad(f1, ((0, Npad - N), (0, Cp - C)))
            f2 = jnp.pad(f2, ((0, Npad - N), (0, Cp - C)))
        f1p = f1.reshape(NP, _LANES)
        f2p = f2.reshape(NP, _LANES)

        # Block-diagonal reduction weights (128, 2G): column g carries wb over
        # the Cp lanes of packed position g; column G+g carries wa.  bcat
        # (2G, 256) scatters both gates back across each position's lanes.
        wbp = jnp.pad(wb, (0, Cp - C))
        wap = jnp.pad(wa, (0, Cp - C))
        eye = jnp.eye(G, dtype=jnp.float32)
        w_red = jnp.concatenate([jnp.kron(eye, wbp.reshape(Cp, 1)),
                                 jnp.kron(eye, wap.reshape(Cp, 1))], axis=1)
        bias = jnp.concatenate([jnp.full((G,), bb),
                                jnp.full((G,), ba)]).reshape(1, 2 * G)
        bcast = jnp.kron(eye, jnp.ones((1, Cp), jnp.float32))        # (G, 128)
        zeros = jnp.zeros_like(bcast)
        bcat = jnp.concatenate(
            [jnp.concatenate([bcast, zeros], axis=1),
             jnp.concatenate([zeros, bcast], axis=1)], axis=0)       # (2G, 256)

        TM, steps = _choose_tm(NP, _LANES * itemsize, mult, tm)
        row_spec = pl.BlockSpec((TM, _LANES), lambda i: (i, 0))

        def const_spec(shp):
            return pl.BlockSpec(shp, lambda i: (0, 0))

        o1p, o2p = pl.pallas_call(
            _bigate_packed_kernel,
            grid=(steps,),
            out_shape=(jax.ShapeDtypeStruct((NP, _LANES), dtype),
                       jax.ShapeDtypeStruct((NP, _LANES), dtype)),
            in_specs=[row_spec, row_spec,
                      const_spec((_LANES, 2 * G)),
                      const_spec((1, 2 * G)),
                      const_spec((2 * G, 2 * _LANES))],
            out_specs=(row_spec, row_spec),
            compiler_params=pltpu.CompilerParams(
                dimension_semantics=("parallel",),
                vmem_limit_bytes=_vmem_limit_bytes(
                    TM, _LANES * itemsize, _LANES * 4)),
            cost_estimate=cost,
        )(f1p, f2p, w_red, bias, bcat)

        o1 = o1p.reshape(Npad, Cp)
        o2 = o2p.reshape(Npad, Cp)
        if Npad != N or Cp != C:
            o1 = o1[:N, :C]
            o2 = o2[:N, :C]
    else:
        # ----- wide-channel fallback (C > 128), still lane-dense per row. -----
        w = jnp.stack([wb, wa], axis=1)                              # (C, 2)
        b = jnp.stack([bb, ba]).reshape(1, 2)

        TM, steps = _choose_tm(N, C * itemsize, mult, tm)
        row_spec = pl.BlockSpec((TM, C), lambda i: (i, 0))
        o1, o2 = pl.pallas_call(
            _bigate_rowwise_kernel,
            grid=(steps,),
            out_shape=(jax.ShapeDtypeStruct((N, C), dtype),
                       jax.ShapeDtypeStruct((N, C), dtype)),
            in_specs=[row_spec, row_spec,
                      pl.BlockSpec((C, 2), lambda i: (0, 0)),
                      pl.BlockSpec((1, 2), lambda i: (0, 0))],
            out_specs=(row_spec, row_spec),
            compiler_params=pltpu.CompilerParams(
                dimension_semantics=("parallel",),
                vmem_limit_bytes=_vmem_limit_bytes(TM, C * itemsize, C * 4)),
            cost_estimate=cost,
        )(f1, f2, w, b)

    return o1.reshape(B, L, C), o2.reshape(B, L, C)


def _reference(feat1, feat2, wb, bb, wa, ba):
    """Pure-JAX transliteration of the PyTorch forward (for checking)."""
    hi = lax.Precision.HIGHEST
    fuse = jnp.transpose(feat1, (0, 2, 1)) + jnp.transpose(feat2, (0, 2, 1))
    m1 = jnp.einsum('bcl,c->bl', fuse, wb, precision=hi) + bb   # b_conv1d
    m2 = jnp.einsum('bcl,c->bl', fuse, wa, precision=hi) + ba   # a_conv1d
    s1 = jax.nn.sigmoid(m1)[..., None]                          # (B, L, 1)
    s2 = jax.nn.sigmoid(m2)[..., None]
    return feat1 + feat2 * s1, feat2 + feat1 * s2


if __name__ == "__main__":
    key = jax.random.PRNGKey(0)
    k1, k2, k3, k4, k5, k6 = jax.random.split(key, 6)

    def check(B, L, C, dtype, atol, rtol):
        f1 = jax.random.normal(k1, (B, L, C), jnp.float32).astype(dtype)
        f2 = jax.random.normal(k2, (B, L, C), jnp.float32).astype(dtype)
        wb = jax.random.normal(k3, (C,), jnp.float32) * 0.1
        bb = jax.random.normal(k4, (), jnp.float32) * 0.1
        wa = jax.random.normal(k5, (C,), jnp.float32) * 0.1
        ba = jax.random.normal(k6, (), jnp.float32) * 0.1
        o1, o2 = bigate_sum1d_2(f1, f2, wb, bb, wa, ba)
        jax.block_until_ready((o1, o2))
        r1, r2 = _reference(f1, f2, wb, bb, wa, ba)
        np.testing.assert_allclose(np.asarray(o1.astype(jnp.float32)),
                                   np.asarray(r1.astype(jnp.float32)),
                                   rtol=rtol, atol=atol)
        np.testing.assert_allclose(np.asarray(o2.astype(jnp.float32)),
                                   np.asarray(r2.astype(jnp.float32)),
                                   rtol=rtol, atol=atol)

    # Primary small shape: g_channel = g_channel_ = 8, seq len 16, batch 2.
    check(2, 16, 8, jnp.float32, 1e-5, 1e-5)
    # Larger, non-tile-aligned row count; N % G == 0 so no wrapper pad/slice,
    # ragged grid blocks handled by the pipeline.
    check(4, 1000, 8, jnp.float32, 1e-5, 1e-5)
    # C does not divide 128 -> channel-padded lane-dense path (Cp = 16).
    check(2, 24, 12, jnp.float32, 1e-5, 1e-5)
    # Wide-channel fallback (C > 128) with the single-matmul logits.
    check(2, 16, 256, jnp.float32, 1e-5, 1e-5)
    # Sub-32-bit input: native-dtype gating, f32 logits/sigmoid.
    check(2, 256, 8, jnp.bfloat16, 5e-2, 5e-2)

    print("KERNEL_OK")
</pallas_src>

<mosaic_0001>
module attributes {stable_mosaic.version = 11 : i64} {
  func.func @_bigate_packed_kernel(%arg0: i32, %arg1: memref<2x128xf32, #tpu.memory_space<vmem>>, %arg2: memref<2x128xf32, #tpu.memory_space<vmem>>, %arg3: memref<128x32xf32, #tpu.memory_space<vmem>>, %arg4: memref<1x32xf32, #tpu.memory_space<vmem>>, %arg5: memref<32x256xf32, #tpu.memory_space<vmem>>, %arg6: memref<2x128xf32, #tpu.memory_space<vmem>>, %arg7: memref<2x128xf32, #tpu.memory_space<vmem>>) attributes {dimension_semantics = [#tpu.dimension_semantics<parallel>], iteration_bounds = array<i64: 1>, scalar_prefetch = 0 : i64, scratch_operands = 0 : i64, tpu.core_type = #tpu.core_type<tc>, window_params = [{transform_indices = @transform_0, window_bounds = array<i64: 2, 128>}, {transform_indices = @transform_1, window_bounds = array<i64: 2, 128>}, {pipeline_mode = #tpu.pipeline_mode<synchronous>, transform_indices = @transform_2, window_bounds = array<i64: 128, 32>}, {pipeline_mode = #tpu.pipeline_mode<synchronous>, transform_indices = @transform_3, window_bounds = array<i64: 1, 32>}, {pipeline_mode = #tpu.pipeline_mode<synchronous>, transform_indices = @transform_4, window_bounds = array<i64: 32, 256>}, {transform_indices = @transform_5, window_bounds = array<i64: 2, 128>}, {transform_indices = @transform_6, window_bounds = array<i64: 2, 128>}]} {
    %c0 = arith.constant 0 : index
    %c0_0 = arith.constant 0 : index
    %0 = vector.load %arg1[%c0, %c0_0] : memref<2x128xf32, #tpu.memory_space<vmem>>, vector<2x128xf32>
    %c0_1 = arith.constant 0 : index
    %c0_2 = arith.constant 0 : index
    %1 = vector.load %arg2[%c0_1, %c0_2] : memref<2x128xf32, #tpu.memory_space<vmem>>, vector<2x128xf32>
    %2 = arith.addf %0, %1 : vector<2x128xf32>
    %c0_3 = arith.constant 0 : index
    %c0_4 = arith.constant 0 : index
    %3 = vector.load %arg3[%c0_3, %c0_4] : memref<128x32xf32, #tpu.memory_space<vmem>>, vector<128x32xf32>
    %cst = arith.constant dense<0.000000e+00> : vector<2x32xf32>
    %4 = tpu.matmul %2, %3, %cst {dimension_numbers = #tpu.dot_dimension_numbers<[1], [0], [0], [1], [0, 0, 1, 1], [], []>} : vector<2x128xf32>, vector<128x32xf32>, vector<2x32xf32> -> vector<2x32xf32>
    %c0_5 = arith.constant 0 : index
    %c0_6 = arith.constant 0 : index
    %5 = vector.load %arg4[%c0_5, %c0_6] : memref<1x32xf32, #tpu.memory_space<vmem>>, vector<1x32xf32>
    %6 = vector.broadcast %5 : vector<1x32xf32> to vector<2x32xf32>
    %7 = arith.addf %4, %6 : vector<2x32xf32>
    %8 = arith.negf %7 : vector<2x32xf32>
    %9 = math.exp %8 : vector<2x32xf32>
    %cst_7 = arith.constant 1.000000e+00 : f32
    %10 = vector.broadcast %cst_7 : f32 to vector<2x32xf32>
    %11 = arith.addf %10, %9 : vector<2x32xf32>
    %12 = arith.divf %10, %11 : vector<2x32xf32>
    %c0_8 = arith.constant 0 : index
    %c0_9 = arith.constant 0 : index
    %13 = vector.load %arg5[%c0_8, %c0_9] : memref<32x256xf32, #tpu.memory_space<vmem>>, vector<32x256xf32>
    %cst_10 = arith.constant dense<0.000000e+00> : vector<2x256xf32>
    %14 = tpu.matmul %12, %13, %cst_10 {dimension_numbers = #tpu.dot_dimension_numbers<[1], [0], [0], [1], [0, 0, 1, 1], [], []>} : vector<2x32xf32>, vector<32x256xf32>, vector<2x256xf32> -> vector<2x256xf32>
    %15 = vector.extract_strided_slice %14 {offsets = [0, 0], sizes = [2, 128], strides = [1, 1]} : vector<2x256xf32> to vector<2x128xf32>
    %16 = vector.extract_strided_slice %14 {offsets = [0, 128], sizes = [2, 128], strides = [1, 1]} : vector<2x256xf32> to vector<2x128xf32>
    %17 = arith.mulf %1, %15 : vector<2x128xf32>
    %18 = arith.addf %0, %17 : vector<2x128xf32>
    %c0_11 = arith.constant 0 : index
    %c0_12 = arith.constant 0 : index
    %19 = vector.load %arg6[%c0_11, %c0_12] : memref<2x128xf32, #tpu.memory_space<vmem>>, vector<2x128xf32>
    tpu.vector_store %arg6[%c0_11, %c0_12], %18 {strides = array<i32>} : memref<2x128xf32, #tpu.memory_space<vmem>>, vector<2x128xf32>,
    %20 = arith.mulf %0, %16 : vector<2x128xf32>
    %21 = arith.addf %1, %20 : vector<2x128xf32>
    %c0_13 = arith.constant 0 : index
    %c0_14 = arith.constant 0 : index
    %22 = vector.load %arg7[%c0_13, %c0_14] : memref<2x128xf32, #tpu.memory_space<vmem>>, vector<2x128xf32>
    tpu.vector_store %arg7[%c0_13, %c0_14], %21 {strides = array<i32>} : memref<2x128xf32, #tpu.memory_space<vmem>>, vector<2x128xf32>,
    return
  }
  func.func @transform_0(%arg0: i32) -> (i32, i32) {
    %c0_i32 = arith.constant 0 : i32
    %c0_i32_0 = arith.constant 0 : i32
    return %arg0, %c0_i32 : i32, i32
  }
  func.func @transform_1(%arg0: i32) -> (i32, i32) {
    %c0_i32 = arith.constant 0 : i32
    %c0_i32_0 = arith.constant 0 : i32
    return %arg0, %c0_i32 : i32, i32
  }
  func.func @transform_2(%arg0: i32) -> (i32, i32) {
    %c0_i32 = arith.constant 0 : i32
    %c0_i32_0 = arith.constant 0 : i32
    %c0_i32_1 = arith.constant 0 : i32
    return %c0_i32, %c0_i32_0 : i32, i32
  }
  func.func @transform_3(%arg0: i32) -> (i32, i32) {
    %c0_i32 = arith.constant 0 : i32
    %c0_i32_0 = arith.constant 0 : i32
    %c0_i32_1 = arith.constant 0 : i32
    return %c0_i32, %c0_i32_0 : i32, i32
  }
  func.func @transform_4(%arg0: i32) -> (i32, i32) {
    %c0_i32 = arith.constant 0 : i32
    %c0_i32_0 = arith.constant 0 : i32
    %c0_i32_1 = arith.constant 0 : i32
    return %c0_i32, %c0_i32_0 : i32, i32
  }
  func.func @transform_5(%arg0: i32) -> (i32, i32) {
    %c0_i32 = arith.constant 0 : i32
    %c0_i32_0 = arith.constant 0 : i32
    return %arg0, %c0_i32 : i32, i32
  }
  func.func @transform_6(%arg0: i32) -> (i32, i32) {
    %c0_i32 = arith.constant 0 : i32
    %c0_i32_0 = arith.constant 0 : i32
    return %arg0, %c0_i32 : i32, i32
  }
}

</mosaic_0001>

<bundles_post_ra>
// kernel: tpu_custom_call.1
= control target key start
LH: loop header
LB: loop body
LE: loop exit
PB: predicated region body
PF: predicated region fallthrough
CT: control target
= control target key end

     0   :  { %12 = vsyncpa [#allocation3], 0  ;;  %v387_v3 = vmov 0.0|0.0   ;;  %vm388_vm0 = vmmov 0   ;;  %v389_v6 = vmov 0.0   ;;  %s532_s0 = inlined_call_operand.vmem [shape: f32[2,128], index: 0, kind: input, shape index: {}]   ;;  %s533_s1 = inlined_call_operand.vmem [shape: f32[2,128], index: 1, kind: input, shape index: {}]   ;;  %s534_s2 = inlined_call_operand.vmem [shape: f32[128,32], index: 2, kind: input, shape index: {}]   ;;  %s535_s3 = inlined_call_operand.vmem [shape: f32[1,32], index: 3, kind: input, shape index: {}]   ;;  %s536_s4 = inlined_call_operand.vmem [shape: f32[32,256], index: 4, kind: input, shape index: {}]   ;;  %s537_s5 = inlined_call_operand.hbm [shape: f32[2,128], index: 5, kind: output, shape index: {0}]   ;;  %s538_s6 = inlined_call_operand.hbm [shape: f32[2,128], index: 6, kind: output, shape index: {1}]  }
   0x1   :  { %v27_v0 = vld [vmem:[%s534_s2] sm:$0xff]  ;;  %v28_v1 = vld [vmem:[%s534_s2 + $0x8] sm:$0xff]  ;;  %v29_v2 = vld [vmem:[%s534_s2 + $0x10] sm:$0xff]  ;;  %298 = vmatprep.subr.bf16.mxu0 %v387_v3  ;;  %295 = vmatprep.mubr.msk.f32.mxu0 %vm388_vm0, %v389_v6 }
   0x2   :  { %v299_v4 = vpack.c.bf16 %v28_v1, %v27_v0  ;;  %v30_v5 = vld [vmem:[%s534_s2 + $0x18] sm:$0xff]  ;;  %202 = vmatprep.mubr.f32.mxu1 %v389_v6  ;;  %v31_v8 = vld [vmem:[%s534_s2 + $0x20] sm:$0xff]  ;;  %v32_v9 = vld [vmem:[%s534_s2 + $0x28] sm:$0xff] }
   0x3   :  { %v302_v7 = vpack.c.bf16 %v30_v5, %v29_v2 }
   0x4   :  { %300 = vmatpush3.bf16.msra.mxu0 %v299_v4 }
   0x5   :  { %301 = vmatprep.subr.bf16.mxu0 %v387_v3 }
   0x6   :  { %13 = vsyncpa [#allocation5], 0  ;;  %v305_v10 = vpack.c.bf16 %v32_v9, %v31_v8  ;;  %v33_v11 = vld [vmem:[%s534_s2 + $0x30] sm:$0xff]  ;;  %v34_v12 = vld [vmem:[%s534_s2 + $0x38] sm:$0xff]  ;;  %vm134_vm1 = vcmask 261120   ;;  %s391_s25 = smov [#allocation4]  }
   0x7   :  { %v308_v13 = vpack.c.bf16 %v34_v12, %v33_v11  ;;  %v35_v14 = vld [vmem:[%s534_s2 + $0x40] sm:$0xff]  ;;  %v36_v15 = vld [vmem:[%s534_s2 + $0x48] sm:$0xff]  ;;  %v37_v17 = vld [vmem:[%s534_s2 + $0x50] sm:$0xff]  ;;  %s231_s26 = sshll.u32 %s391_s25, 4  ;;  %s232_s26 = int_to_ptr.vmem [resolvable:$true] %s231_s26 }
   0x8   :  { %303 = vmatpush3.bf16.msra.mxu0 %v302_v7  ;;  %v311_v16 = vpack.c.bf16 %v36_v15, %v35_v14  ;;  %v38_v18 = vld [vmem:[%s534_s2 + $0x58] sm:$0xff]  ;;  %v39_v20 = vld [vmem:[%s534_s2 + $0x60] sm:$0xff]  ;;  %v40_v21 = vld [vmem:[%s534_s2 + $0x68] sm:$0xff] }
   0x9   :  { %304 = vmatprep.subr.bf16.mxu0 %v387_v3  ;;  %v314_v19 = vpack.c.bf16 %v38_v18, %v37_v17  ;;  %v317_v22 = vpack.c.bf16 %v40_v21, %v39_v20  ;;  %v41_v23 = vld [vmem:[%s534_s2 + $0x70] sm:$0xff]  ;;  %v42_v24 = vld [vmem:[%s534_s2 + $0x78] sm:$0xff]  ;;  %v24_v26 = vld [vmem:[%s532_s0] sm:$0x3] }
   0xa   :  { %v320_v25 = vpack.c.bf16 %v42_v24, %v41_v23  ;;  %v25_v27 = vld [vmem:[%s533_s1] sm:$0x3]  ;;  %v127_v29 = vld [vmem:[%s536_s4 + $0x8] sm:$0xff]  ;;  %v129_v30 = vld [vmem:[%s536_s4 + $0x18] sm:$0xff] }
   0xb   :  { %v26_v28 = vadd.f32 %v25_v27, %v24_v26  ;;  %v126_v31 = vld [vmem:[%s536_s4] sm:$0xff]  ;;  %v322_v32 = vpack.c.bf16 %v129_v30, %v127_v29  ;;  %v128_v33 = vld [vmem:[%s536_s4 + $0x10] sm:$0xff]  ;;  %v131_v34 = vld [vmem:[%s536_s4 + $0x28] sm:$0xff] }
   0xc   :  { %306 = vmatpush3.bf16.msra.mxu0 %v305_v10  ;;  %v133_v35 = vld [vmem:[%s536_s4 + $0x38] sm:$0xff]  ;;  %v324_v36 = vpack.c.bf16 %v128_v33, %v126_v31  ;;  %v130_v38 = vld [vmem:[%s536_s4 + $0x20] sm:$0xff]  ;;  %v132_v39 = vld [vmem:[%s536_s4 + $0x30] sm:$0xff]  ;;  %s390_s4 = smov [#allocation2]  }
   0xd   :  { %307 = vmatprep.subr.bf16.mxu0 %v387_v3  ;;  %v326_v37 = vpack.c.bf16 %v133_v35, %v131_v34  ;;  %323 = vmatprep.subr.bf16.mxu1 %v322_v32  ;;  %v328_v40 = vpack.c.bf16 %v132_v39, %v130_v38  ;;  %v243_v41 = vld [vmem:[%s535_s3] ss:$0 sm:$0xff]  ;;  %s221_s24 = sshll.u32 %s390_s4, 4  ;;  %s222_s24 = int_to_ptr.vmem [resolvable:$true] %s221_s24 }
   0xe   :  { %325 = vmatpush1.bf16.msra.mxu1 %v324_v36  ;;  %s339_s3 = scalar_lea.vmem %s222_s24, 32  ;;  %p344_p1 = scmp.lt.s32.totalorder %s222_s24, %s222_s24 }
   0xf   :  { %327 = vmatprep.subr.bf16.mxu1 %v326_v37  ;;  %p340_p0 = scmp.ne.s32.totalorder %s222_s24, %s339_s3  ;;  %p345_p2 = scmp.lt.s32.totalorder %s339_s3, %s339_s3 }
  0x10   :  { %309 = vmatpush3.bf16.msra.mxu0 %v308_v13 }
  0x11   :  { %310 = vmatprep.subr.bf16.mxu0 %v387_v3  ;;  %p346_p3 = por %p345_p2, %p344_p1 }
  0x12   :  { %329 = vmatpush1.bf16.msra.mxu1 %v328_v40 }
  0x13   :  { %p347_p4 = pnand %p346_p3, %p340_p0 }
  0x14   :  { %312 = vmatpush3.bf16.msra.mxu0 %v311_v16 }
  0x15   :  { %313 = vmatprep.subr.bf16.mxu0 %v387_v3 }
  0x18   :  { %315 = vmatpush3.bf16.msra.mxu0 %v314_v19 }
  0x19   :  { %316 = vmatprep.subr.bf16.mxu0 %v387_v3 }
  0x1c   :  { %318 = vmatpush3.bf16.msra.mxu0 %v317_v22 }
  0x1d   :  { %319 = vmatprep.subr.bf16.mxu0 %v387_v3 }
  0x20   :  { %321 = vmatpush3.bf16.msra.mxu0 %v320_v25 }
  0x23   :  { %296 = vmatmul.mubr.f32.vlgmr.msra.gmra.mrb[0].mxu0 %v26_v28 }
  0xf6   :  { %v116_v42 = vpop.f32.mrb[0].mxu0 }
  0xf7   :  { %v117_v43 = vadd.f32 %v243_v41, %v116_v42  ;;  %v297_v44 = vpop.f32.mrb[1].mxu0 }
  0xf9   :  { %v244_v45 = vmul.f32 -1.442695, %v117_v43 }
  0xfb   :  { %335 = vpow2.f32 %v244_v45 }
 0x105   :  { %v336_v46 = vpop.eup %335 }
 0x106   :  { %v123_v47 = vadd.f32 1.0, %v336_v46 }
 0x108   :  { %337 = vrcp.f32 %v123_v47 }
 0x112   :  { %v338_v48 = vpop.eup %337 }
 0x113   :  { %245 = vmatmul.mubr.msk.f32.vlgmr.msra.gmra.mrb[0].mxu1 %vm134_vm1, %v338_v48 }
 0x1e6   :  { %v204_v49 = vpop.f32.mrb[0].mxu1 }
 0x1e7   :  { %v209_v50 = vmul.f32 %v204_v49, %v25_v27  ;;  %v206_v51 = vpop.f32.mrb[1].mxu1 }
 0x1e8   :  { %v212_v52 = vmul.f32 %v206_v51, %v24_v26 }
 0x1e9   :  { %v210_v53 = vadd.f32 %v209_v50, %v24_v26 }
 0x1ea   :  { %v213_v54 = vadd.f32 %v212_v52, %v25_v27 }
 0x1eb   :  { %211 = vst [vmem:[#allocation2] sm:$0x3] %v210_v53 }
 0x1ec   :  { %350 = shalt.err (!%p347_p4)
}
 0x1ed   :  { %s351_s29 = scalar_lea.hbm %s537_s5, 32 }
 0x1ee   :  { %p352_p5 = scmp.ne.s32.totalorder %s537_s5, %s351_s29  ;;  %p355_p6 = scmp.lt.u32.totalorder %s351_s29, %s537_s5 }
 0x1f0   :  { %p357_p7 = pnand %p355_p6, %p352_p5 }
 0x1f2   :  { %360 = shalt.err (!%p357_p7)
}
 0x1f3   :  { %224 = dma.vmem_to_hbm [thread:$0]  %s222_s24, 32, %s537_s5, [#allocation3]   ;;  %214 = vst [vmem:[#allocation4] sm:$0x3] %v213_v54 }
 0x1f4   :  { %s361_s2 = scalar_lea.vmem %s232_s26, 32  ;;  %p366_p9 = scmp.lt.s32.totalorder %s232_s26, %s232_s26 }
 0x1f5   :  { %p362_p8 = scmp.ne.s32.totalorder %s232_s26, %s361_s2  ;;  %p367_p10 = scmp.lt.s32.totalorder %s361_s2, %s361_s2 }
 0x1f7   :  { %p368_p11 = por %p367_p10, %p366_p9 }
 0x1f9   :  { %p369_p12 = pnand %p368_p11, %p362_p8 }
 0x1fb   :  { %372 = shalt.err (!%p369_p12)
}
 0x1fc   :  { %s373_s0 = scalar_lea.hbm %s538_s6, 32 }
 0x1fd   :  { %p374_p13 = scmp.ne.s32.totalorder %s538_s6, %s373_s0  ;;  %p377_p0 = scmp.lt.u32.totalorder %s373_s0, %s538_s6 }
 0x1ff   :  { %p379_p1 = pnand %p377_p0, %p374_p13 }
 0x201   :  { %382 = shalt.err (!%p379_p1)
}
 0x202   :  { %234 = dma.vmem_to_hbm [thread:$0]  %s232_s26, 32, %s538_s6, [#allocation5]  }
 0x203   :  { %383 = dma.done.wait [#allocation3], 32  }
 0x204   :  { %384 = vsyncadd [#allocation3], 4294967264 }
 0x205   :  { %385 = dma.done.wait [#allocation5], 32  }
 0x206   :  { %386 = vsyncadd [#allocation5], 4294967264 }
 0x207   :  { %241 = vsyncpa [#allocation3], 1 }
 0x208   :  { %242 = vsyncpa [#allocation5], 1 }

</bundles_post_ra>
